<compile_context>
chip_gen: v5e
topology: v5e:2x2
jax: 0.10.0
libtpu: 0.0.40
codegen_flags: <defaults>
</compile_context>

<pallas_src>
import jax
import jax.numpy as jnp
from jax.experimental import pallas as pl
from jax.experimental.pallas import tpu as pltpu

# ----------------------------- problem sizes --------------------------------
B = 2            # batch
C = 1            # channels (single-channel CT images)
H = W = 16       # image spatial size
N_ANGLES = 16    # projection angles in the full sinogram
N_DET = 16       # detector bins per angle
SUBSAMPLE = 4    # subsample_factor
HIDDEN = 128     # hidden width of the sinogram-completion MLP

IMG_FLAT = H * W                                # 256
SINO_FLAT = N_ANGLES * N_DET                    # 256
SPARSE_FLAT = (N_ANGLES // SUBSAMPLE) * N_DET   # 64


# ------------------------------ fused Pallas kernel --------------------------
def _fused_kernel(x_ref, proj_ref, m1_ref, b1_ref, w2_ref, b2_ref,
                  w2d_ref, b2d_ref, sino_ref, rec_ref, img_ref):
    x = x_ref[...]                                          # bf16 [Mpad, 256]

    # --- FBPModule.encode: full Radon transform (for the `sinograms` output)
    sino_ref[...] = jnp.dot(x, proj_ref[...],
                            preferred_element_type=jnp.float32)

    # --- sinogram-completion MLP on the angle-subsampled sinogram.
    # The sparse-angle selection is folded into m1 = proj[:, sparse] @ w1 at
    # init, so this chain does not wait on the full encode matmul above.
    h = jnp.dot(x, m1_ref[...], preferred_element_type=jnp.float32) + b1_ref[...]
    h = jnp.maximum(h, 0.0)                                 # f32 elementwise
    hb = h.astype(jnp.bfloat16)

    # --- reconstructed sinogram output: rec = relu(...) @ w2 + b2
    rec_ref[...] = jnp.dot(hb, w2_ref[...],
                           preferred_element_type=jnp.float32) + b2_ref[...]

    # --- FBPModule.decode fused with per-image min/max normalization.
    # decode operator is pre-folded (w2d = w2 @ backproj), so it depends only
    # on `h`, not on rec_ref.
    img = jnp.dot(hb, w2d_ref[...],
                  preferred_element_type=jnp.float32) + b2d_ref[...]
    i_min = jnp.min(img, axis=1, keepdims=True)
    i_max = jnp.max(img, axis=1, keepdims=True)
    img_ref[...] = (img - i_min) / (i_max - i_min + 1e-8)


def _full_spec(shape):
    # Whole-array block (block shape == full array dims), grid=(1,)
    return pl.BlockSpec(shape, lambda i: (0,) * len(shape))


def _fused_forward(x_pad, params):
    m_pad, img_flat = x_pad.shape
    sino_flat = params["proj"].shape[1]
    hidden = params["m1"].shape[1]
    return pl.pallas_call(
        _fused_kernel,
        grid=(1,),
        in_specs=[_full_spec((m_pad, img_flat)),        # x (bf16)
                  _full_spec((img_flat, sino_flat)),    # proj (bf16)
                  _full_spec((img_flat, hidden)),       # m1 (bf16)
                  _full_spec((1, hidden)),              # b1 (f32)
                  _full_spec((hidden, sino_flat)),      # w2 (bf16)
                  _full_spec((1, sino_flat)),           # b2 (f32)
                  _full_spec((hidden, img_flat)),       # w2d (bf16)
                  _full_spec((1, img_flat))],           # b2d (f32)
        out_specs=[_full_spec((m_pad, sino_flat)),
                   _full_spec((m_pad, sino_flat)),
                   _full_spec((m_pad, img_flat))],
        out_shape=[jax.ShapeDtypeStruct((m_pad, sino_flat), jnp.float32),
                   jax.ShapeDtypeStruct((m_pad, sino_flat), jnp.float32),
                   jax.ShapeDtypeStruct((m_pad, img_flat), jnp.float32)],
        compiler_params=pltpu.CompilerParams(
            dimension_semantics=("arbitrary",)),
    )(x_pad, params["proj"], params["m1"], params["b1"],
      params["w2"], params["b2"], params["w2d"], params["b2d"])


# ------------------------------ params (with folds) ---------------------------
def init_params(key, subsample_factor=SUBSAMPLE):
    k_proj, k_back, k_w1, k_w2 = jax.random.split(key, 4)
    sparse_flat = (N_ANGLES // subsample_factor) * N_DET

    # FBPModule.encode / decode operators (synthetic dense stand-ins)
    proj = (jax.random.normal(k_proj, (IMG_FLAT, SINO_FLAT), jnp.float32)
            / jnp.sqrt(IMG_FLAT))
    backproj = (jax.random.normal(k_back, (SINO_FLAT, IMG_FLAT), jnp.float32)
                / jnp.sqrt(SINO_FLAT))
    # sinogram-completion MLP (stand-in for model_cls(**model_kwargs))
    w1 = (jax.random.normal(k_w1, (sparse_flat, HIDDEN), jnp.float32)
          / jnp.sqrt(sparse_flat))
    b1 = jnp.zeros((1, HIDDEN), jnp.float32)
    w2 = (jax.random.normal(k_w2, (HIDDEN, SINO_FLAT), jnp.float32)
          / jnp.sqrt(HIDDEN))
    b2 = jnp.zeros((1, SINO_FLAT), jnp.float32)

    # fold the angle subsample into the first MLP layer (f32 math, then bf16):
    #   sparse columns of the flat sinogram are the rows with angle % k == 0.
    proj_sparse = proj.reshape(IMG_FLAT, N_ANGLES, N_DET)[:, ::subsample_factor, :]
    proj_sparse = proj_sparse.reshape(IMG_FLAT, sparse_flat)
    m1 = proj_sparse @ w1                       # [IMG_FLAT, HIDDEN]

    # fold the decode (FBP) operator into the second MLP layer.
    w2d = w2 @ backproj                         # [HIDDEN, IMG_FLAT]
    b2d = b2 @ backproj                         # [1, IMG_FLAT]

    return {
        "proj": proj.astype(jnp.bfloat16),
        "m1": m1.astype(jnp.bfloat16),
        "b1": b1,
        "w2": w2.astype(jnp.bfloat16),
        "b2": b2,
        "w2d": w2d.astype(jnp.bfloat16),
        "b2d": b2d,
    }


# ------------------------------ RecModel forward ------------------------------
@jax.jit
def rec_model_forward(images, params):
    """Mirror of RecModel.forward: returns (images, sinograms, rec_sinograms)."""
    b, c, h, w = images.shape
    assert c == 1, "single-channel CT images (normalize flattens over C*H*W)"

    m = b * c
    m_pad = ((m + 7) // 8) * 8                  # sublane-aligned row count
    x = images.reshape(m, h * w).astype(jnp.bfloat16)
    x = jnp.pad(x, ((0, m_pad - m), (0, 0)))

    sino_flat, rec_flat, img_flat = _fused_forward(x, params)

    sinograms = sino_flat[:m].reshape(b, c, N_ANGLES, N_DET)
    rec_sinograms = rec_flat[:m].reshape(b, c, N_ANGLES, N_DET)
    images_out = img_flat[:m].reshape(b, c, h, w)
    return images_out, sinograms, rec_sinograms


# ----------------------------------- main -------------------------------------
if __name__ == "__main__":
    key = jax.random.PRNGKey(0)
    k_img, k_par = jax.random.split(key)
    images = jax.random.normal(k_img, (B, C, H, W), jnp.float32)
    params = init_params(k_par)

    out_images, sinograms, rec_sinograms = rec_model_forward(images, params)
    jax.block_until_ready((out_images, sinograms, rec_sinograms))

    assert out_images.shape == (B, C, H, W)
    assert sinograms.shape == (B, C, N_ANGLES, N_DET)
    assert rec_sinograms.shape == (B, C, N_ANGLES, N_DET)
    assert bool(jnp.isfinite(out_images).all())
    assert bool(jnp.isfinite(sinograms).all())
    assert bool(jnp.isfinite(rec_sinograms).all())
    # normalized images must lie in [0, 1] (small slack for bf16 weights)
    assert float(jnp.min(out_images)) >= -1e-3
    assert float(jnp.max(out_images)) <= 1.0 + 1e-3

    print("KERNEL_OK")
</pallas_src>

<mosaic_0001>
module attributes {stable_mosaic.version = 11 : i64} {
  func.func @_fused_kernel(%arg0: i32, %arg1: memref<8x256xbf16, #tpu.memory_space<vmem>>, %arg2: memref<256x256xbf16, #tpu.memory_space<vmem>>, %arg3: memref<256x128xbf16, #tpu.memory_space<vmem>>, %arg4: memref<1x128xf32, #tpu.memory_space<vmem>>, %arg5: memref<128x256xbf16, #tpu.memory_space<vmem>>, %arg6: memref<1x256xf32, #tpu.memory_space<vmem>>, %arg7: memref<128x256xbf16, #tpu.memory_space<vmem>>, %arg8: memref<1x256xf32, #tpu.memory_space<vmem>>, %arg9: memref<8x256xf32, #tpu.memory_space<vmem>>, %arg10: memref<8x256xf32, #tpu.memory_space<vmem>>, %arg11: memref<8x256xf32, #tpu.memory_space<vmem>>) attributes {dimension_semantics = [#tpu.dimension_semantics<arbitrary>], iteration_bounds = array<i64: 1>, scalar_prefetch = 0 : i64, scratch_operands = 0 : i64, tpu.core_type = #tpu.core_type<tc>, window_params = [{pipeline_mode = #tpu.pipeline_mode<synchronous>, transform_indices = @transform_0, window_bounds = array<i64: 8, 256>}, {pipeline_mode = #tpu.pipeline_mode<synchronous>, transform_indices = @transform_1, window_bounds = array<i64: 256, 256>}, {pipeline_mode = #tpu.pipeline_mode<synchronous>, transform_indices = @transform_2, window_bounds = array<i64: 256, 128>}, {pipeline_mode = #tpu.pipeline_mode<synchronous>, transform_indices = @transform_3, window_bounds = array<i64: 1, 128>}, {pipeline_mode = #tpu.pipeline_mode<synchronous>, transform_indices = @transform_4, window_bounds = array<i64: 128, 256>}, {pipeline_mode = #tpu.pipeline_mode<synchronous>, transform_indices = @transform_5, window_bounds = array<i64: 1, 256>}, {pipeline_mode = #tpu.pipeline_mode<synchronous>, transform_indices = @transform_6, window_bounds = array<i64: 128, 256>}, {pipeline_mode = #tpu.pipeline_mode<synchronous>, transform_indices = @transform_7, window_bounds = array<i64: 1, 256>}, {pipeline_mode = #tpu.pipeline_mode<synchronous>, transform_indices = @transform_8, window_bounds = array<i64: 8, 256>}, {pipeline_mode = #tpu.pipeline_mode<synchronous>, transform_indices = @transform_9, window_bounds = array<i64: 8, 256>}, {pipeline_mode = #tpu.pipeline_mode<synchronous>, transform_indices = @transform_10, window_bounds = array<i64: 8, 256>}]} {
    %c0 = arith.constant 0 : index
    %c0_0 = arith.constant 0 : index
    %0 = vector.load %arg1[%c0, %c0_0] : memref<8x256xbf16, #tpu.memory_space<vmem>>, vector<8x256xbf16>
    %c0_1 = arith.constant 0 : index
    %c0_2 = arith.constant 0 : index
    %1 = vector.load %arg2[%c0_1, %c0_2] : memref<256x256xbf16, #tpu.memory_space<vmem>>, vector<256x256xbf16>
    %cst = arith.constant dense<0.000000e+00> : vector<8x256xf32>
    %2 = tpu.matmul %0, %1, %cst {dimension_numbers = #tpu.dot_dimension_numbers<[1], [0], [0], [1], [0, 0, 1, 1], [], []>} : vector<8x256xbf16>, vector<256x256xbf16>, vector<8x256xf32> -> vector<8x256xf32>
    %c0_3 = arith.constant 0 : index
    %c0_4 = arith.constant 0 : index
    %3 = vector.load %arg9[%c0_3, %c0_4] : memref<8x256xf32, #tpu.memory_space<vmem>>, vector<8x256xf32>
    tpu.vector_store %arg9[%c0_3, %c0_4], %2 {strides = array<i32>} : memref<8x256xf32, #tpu.memory_space<vmem>>, vector<8x256xf32>,
    %c0_5 = arith.constant 0 : index
    %c0_6 = arith.constant 0 : index
    %4 = vector.load %arg3[%c0_5, %c0_6] : memref<256x128xbf16, #tpu.memory_space<vmem>>, vector<256x128xbf16>
    %cst_7 = arith.constant dense<0.000000e+00> : vector<8x128xf32>
    %5 = tpu.matmul %0, %4, %cst_7 {dimension_numbers = #tpu.dot_dimension_numbers<[1], [0], [0], [1], [0, 0, 1, 1], [], []>} : vector<8x256xbf16>, vector<256x128xbf16>, vector<8x128xf32> -> vector<8x128xf32>
    %c0_8 = arith.constant 0 : index
    %c0_9 = arith.constant 0 : index
    %6 = vector.load %arg4[%c0_8, %c0_9] : memref<1x128xf32, #tpu.memory_space<vmem>>, vector<1x128xf32>
    %7 = vector.broadcast %6 : vector<1x128xf32> to vector<8x128xf32>
    %8 = arith.addf %5, %7 : vector<8x128xf32>
    %cst_10 = arith.constant 0.000000e+00 : f32
    %9 = vector.broadcast %cst_10 : f32 to vector<8x128xf32>
    %10 = arith.maximumf %8, %9 : vector<8x128xf32>
    %11 = arith.truncf %10 : vector<8x128xf32> to vector<8x128xbf16>
    %c0_11 = arith.constant 0 : index
    %c0_12 = arith.constant 0 : index
    %12 = vector.load %arg5[%c0_11, %c0_12] : memref<128x256xbf16, #tpu.memory_space<vmem>>, vector<128x256xbf16>
    %cst_13 = arith.constant dense<0.000000e+00> : vector<8x256xf32>
    %13 = tpu.matmul %11, %12, %cst_13 {dimension_numbers = #tpu.dot_dimension_numbers<[1], [0], [0], [1], [0, 0, 1, 1], [], []>} : vector<8x128xbf16>, vector<128x256xbf16>, vector<8x256xf32> -> vector<8x256xf32>
    %c0_14 = arith.constant 0 : index
    %c0_15 = arith.constant 0 : index
    %14 = vector.load %arg6[%c0_14, %c0_15] : memref<1x256xf32, #tpu.memory_space<vmem>>, vector<1x256xf32>
    %15 = vector.broadcast %14 : vector<1x256xf32> to vector<8x256xf32>
    %16 = arith.addf %13, %15 : vector<8x256xf32>
    %c0_16 = arith.constant 0 : index
    %c0_17 = arith.constant 0 : index
    %17 = vector.load %arg10[%c0_16, %c0_17] : memref<8x256xf32, #tpu.memory_space<vmem>>, vector<8x256xf32>
    tpu.vector_store %arg10[%c0_16, %c0_17], %16 {strides = array<i32>} : memref<8x256xf32, #tpu.memory_space<vmem>>, vector<8x256xf32>,
    %c0_18 = arith.constant 0 : index
    %c0_19 = arith.constant 0 : index
    %18 = vector.load %arg7[%c0_18, %c0_19] : memref<128x256xbf16, #tpu.memory_space<vmem>>, vector<128x256xbf16>
    %cst_20 = arith.constant dense<0.000000e+00> : vector<8x256xf32>
    %19 = tpu.matmul %11, %18, %cst_20 {dimension_numbers = #tpu.dot_dimension_numbers<[1], [0], [0], [1], [0, 0, 1, 1], [], []>} : vector<8x128xbf16>, vector<128x256xbf16>, vector<8x256xf32> -> vector<8x256xf32>
    %c0_21 = arith.constant 0 : index
    %c0_22 = arith.constant 0 : index
    %20 = vector.load %arg8[%c0_21, %c0_22] : memref<1x256xf32, #tpu.memory_space<vmem>>, vector<1x256xf32>
    %21 = vector.broadcast %20 : vector<1x256xf32> to vector<8x256xf32>
    %22 = arith.addf %19, %21 : vector<8x256xf32>
    %cst_23 = arith.constant dense<0x7F800000> : vector<8xf32>
    %23 = vector.multi_reduction <minimumf>, %22, %cst_23 [1] : vector<8x256xf32> to vector<8xf32>
    %24 = vector.shape_cast %23 : vector<8xf32> to vector<8x1xf32>
    %cst_24 = arith.constant dense<0xFF800000> : vector<8xf32>
    %25 = vector.multi_reduction <maximumf>, %22, %cst_24 [1] : vector<8x256xf32> to vector<8xf32>
    %26 = vector.shape_cast %25 : vector<8xf32> to vector<8x1xf32>
    %27 = vector.broadcast %24 : vector<8x1xf32> to vector<8x256xf32>
    %28 = arith.subf %22, %27 : vector<8x256xf32>
    %29 = arith.subf %26, %24 : vector<8x1xf32>
    %cst_25 = arith.constant 9.99999993E-9 : f32
    %30 = vector.broadcast %cst_25 : f32 to vector<8x1xf32>
    %31 = arith.addf %29, %30 : vector<8x1xf32>
    %32 = vector.broadcast %31 : vector<8x1xf32> to vector<8x256xf32>
    %33 = arith.divf %28, %32 : vector<8x256xf32>
    %c0_26 = arith.constant 0 : index
    %c0_27 = arith.constant 0 : index
    %34 = vector.load %arg11[%c0_26, %c0_27] : memref<8x256xf32, #tpu.memory_space<vmem>>, vector<8x256xf32>
    tpu.vector_store %arg11[%c0_26, %c0_27], %33 {strides = array<i32>} : memref<8x256xf32, #tpu.memory_space<vmem>>, vector<8x256xf32>,
    return
  }
  func.func @transform_0(%arg0: i32) -> (i32, i32) {
    %c0_i32 = arith.constant 0 : i32
    %c0_i32_0 = arith.constant 0 : i32
    %c0_i32_1 = arith.constant 0 : i32
    return %c0_i32, %c0_i32_0 : i32, i32
  }
  func.func @transform_1(%arg0: i32) -> (i32, i32) {
    %c0_i32 = arith.constant 0 : i32
    %c0_i32_0 = arith.constant 0 : i32
    %c0_i32_1 = arith.constant 0 : i32
    return %c0_i32, %c0_i32_0 : i32, i32
  }
  func.func @transform_2(%arg0: i32) -> (i32, i32) {
    %c0_i32 = arith.constant 0 : i32
    %c0_i32_0 = arith.constant 0 : i32
    %c0_i32_1 = arith.constant 0 : i32
    return %c0_i32, %c0_i32_0 : i32, i32
  }
  func.func @transform_3(%arg0: i32) -> (i32, i32) {
    %c0_i32 = arith.constant 0 : i32
    %c0_i32_0 = arith.constant 0 : i32
    %c0_i32_1 = arith.constant 0 : i32
    return %c0_i32, %c0_i32_0 : i32, i32
  }
  func.func @transform_4(%arg0: i32) -> (i32, i32) {
    %c0_i32 = arith.constant 0 : i32
    %c0_i32_0 = arith.constant 0 : i32
    %c0_i32_1 = arith.constant 0 : i32
    return %c0_i32, %c0_i32_0 : i32, i32
  }
  func.func @transform_5(%arg0: i32) -> (i32, i32) {
    %c0_i32 = arith.constant 0 : i32
    %c0_i32_0 = arith.constant 0 : i32
    %c0_i32_1 = arith.constant 0 : i32
    return %c0_i32, %c0_i32_0 : i32, i32
  }
  func.func @transform_6(%arg0: i32) -> (i32, i32) {
    %c0_i32 = arith.constant 0 : i32
    %c0_i32_0 = arith.constant 0 : i32
    %c0_i32_1 = arith.constant 0 : i32
    return %c0_i32, %c0_i32_0 : i32, i32
  }
  func.func @transform_7(%arg0: i32) -> (i32, i32) {
    %c0_i32 = arith.constant 0 : i32
    %c0_i32_0 = arith.constant 0 : i32
    %c0_i32_1 = arith.constant 0 : i32
    return %c0_i32, %c0_i32_0 : i32, i32
  }
  func.func @transform_8(%arg0: i32) -> (i32, i32) {
    %c0_i32 = arith.constant 0 : i32
    %c0_i32_0 = arith.constant 0 : i32
    %c0_i32_1 = arith.constant 0 : i32
    return %c0_i32, %c0_i32_0 : i32, i32
  }
  func.func @transform_9(%arg0: i32) -> (i32, i32) {
    %c0_i32 = arith.constant 0 : i32
    %c0_i32_0 = arith.constant 0 : i32
    %c0_i32_1 = arith.constant 0 : i32
    return %c0_i32, %c0_i32_0 : i32, i32
  }
  func.func @transform_10(%arg0: i32) -> (i32, i32) {
    %c0_i32 = arith.constant 0 : i32
    %c0_i32_0 = arith.constant 0 : i32
    %c0_i32_1 = arith.constant 0 : i32
    return %c0_i32, %c0_i32_0 : i32, i32
  }
}

</mosaic_0001>

<bundles_post_ra>
// kernel: rec_model_forward.1
= control target key start
LH: loop header
LB: loop body
LE: loop exit
PB: predicated region body
PF: predicated region fallthrough
CT: control target
= control target key end

     0   :  { %16 = vsyncpa [#allocation3], 0  ;;  %s1438_s0 = inlined_call_operand.vmem [shape: bf16[8,256], index: 0, kind: input, shape index: {}]   ;;  %s1439_s1 = inlined_call_operand.hbm [shape: bf16[256,256], index: 1, kind: input, shape index: {}]   ;;  %s1440_s2 = inlined_call_operand.hbm [shape: bf16[256,128], index: 2, kind: input, shape index: {}]   ;;  %s1441_s3 = inlined_call_operand.vmem [shape: f32[1,128], index: 3, kind: input, shape index: {}]   ;;  %s1442_s4 = inlined_call_operand.hbm [shape: bf16[128,256], index: 4, kind: input, shape index: {}]   ;;  %s1443_s5 = inlined_call_operand.vmem [shape: f32[1,256], index: 5, kind: input, shape index: {}]   ;;  %s1444_s6 = inlined_call_operand.hbm [shape: bf16[128,256], index: 6, kind: input, shape index: {}]   ;;  %s1445_s7 = inlined_call_operand.vmem [shape: f32[1,256], index: 7, kind: input, shape index: {}]   ;;  %s1446_s8 = inlined_call_operand.vmem [shape: f32[8,256], index: 8, kind: output, shape index: {0}]   ;;  %s1447_s9 = inlined_call_operand.vmem [shape: f32[8,256], index: 9, kind: output, shape index: {1}]   ;;  %s1448_s10 = inlined_call_operand.vmem [shape: f32[8,256], index: 10, kind: output, shape index: {2}]  }
   0x1   :  { %17 = vsyncpa [#allocation5], 0  ;;  %s38_s15 = sshll.u32 %s1440_s2, 4  ;;  %s39_s15 = int_to_ptr.hbm [resolvable:$true] %s38_s15 }
   0x2   :  { %18 = vsyncpa [#allocation8], 0  ;;  %s1323_s16 = smov [#allocation4]   ;;  %s25_s20 = sshll.u32 %s1439_s1, 4  ;;  %s26_s20 = int_to_ptr.hbm [resolvable:$true] %s25_s20 }
   0x3   :  { %s40_s17 = sshll.u32 %s1323_s16, 4  ;;  %s1324_s21 = smov 64   ;;  %s41_s17 = int_to_ptr.vmem [resolvable:$true] %s40_s17 }
   0x4   :  { %s1325_s22 = smov 4   ;;  %s1326_s23 = smov [#allocation2]  }
   0x5   :  { %46 = dma.hbm_to_vmem [thread:$0]  %s39_s15, 2048, %s41_s17, [#allocation5], %s1324_s21, %s1324_s21, %s1325_s22  }
   0x6   :  { %s27_s24 = sshll.u32 %s1326_s23, 4  ;;  %s1327_s25 = smov 128   ;;  %s28_s24 = int_to_ptr.vmem [resolvable:$true] %s27_s24 }
   0x7   :  { %s1328_s26 = smov 8   ;;  %s53_s28 = sshll.u32 %s1442_s4, 4  ;;  %s54_s28 = int_to_ptr.hbm [resolvable:$true] %s53_s28 }
   0x8   :  { %33 = dma.hbm_to_vmem [thread:$0]  %s26_s20, 4096, %s28_s24, [#allocation3], %s1327_s25, %s1327_s25, %s1328_s26  }
   0x9   :  { %s1329_s29 = smov [#allocation6]   ;;  %s68_s12 = sshll.u32 %s1444_s6, 4  ;;  %s69_s12 = int_to_ptr.hbm [resolvable:$true] %s68_s12 }
   0xa   :  { %s55_s30 = sshll.u32 %s1329_s29, 4  ;;  %s1330_s13 = smov [#allocation7]   ;;  %s56_s30 = int_to_ptr.vmem [resolvable:$true] %s55_s30 }
   0xb   :  { %61 = dma.hbm_to_vmem [thread:$0]  %s54_s28, 2048, %s56_s30, [#allocation5], %s1327_s25, %s1327_s25, %s1328_s26  }
   0xc   :  { %s70_s14 = sshll.u32 %s1330_s13, 4  ;;  %s71_s14 = int_to_ptr.vmem [resolvable:$true] %s70_s14 }
   0xd   :  { %76 = dma.hbm_to_vmem [thread:$0]  %s69_s12, 2048, %s71_s14, [#allocation8], %s1327_s25, %s1327_s25, %s1328_s26  }
   0xe   :  { %1317 = dma.done.wait [#allocation3], 4096  }
   0xf   :  { %1318 = vsyncadd [#allocation3], 4294963200 }
  0x10   :  { %1319 = dma.done.wait [#allocation5], 4096  }
  0x11   :  { %1320 = vsyncadd [#allocation5], 4294963200 }
  0x12   :  { %1321 = dma.done.wait [#allocation8], 2048  }
  0x13   :  { %1322 = vsyncadd [#allocation8], 4294965248  ;;  %v868_v0 = vld [vmem:[#allocation2 + $0x70] sm:$0xf]  ;;  %v1145_v1 = vld [vmem:[#allocation2 + $0x74] sm:$0xf0] }
  0x14   :  { %v932_v2 = vld [vmem:[#allocation2 + $0xf0] sm:$0xf]  ;;  %v869_v3 = vor.u32 %v1145_v1, %v868_v0  ;;  %v1161_v4 = vld [vmem:[#allocation2 + $0xf4] sm:$0xf0]  ;;  %v860_v5 = vld [vmem:[#allocation2 + $0x60] sm:$0xf] }
  0x15   :  { %v1143_v6 = vld [vmem:[#allocation2 + $0x64] sm:$0xf0]  ;;  %v933_v7 = vor.u32 %v1161_v4, %v932_v2  ;;  %v924_v8 = vld [vmem:[#allocation2 + $0xe0] sm:$0xf]  ;;  %v852_v12 = vld [vmem:[#allocation2 + $0x50] sm:$0xf] }
  0x16   :  { %v1159_v9 = vld [vmem:[#allocation2 + $0xe4] sm:$0xf0]  ;;  %295 = vmatpush.bf16.msra.mxu0 %v869_v3  ;;  %v861_v10 = vor.u32 %v1143_v6, %v860_v5  ;;  %v1141_v13 = vld [vmem:[#allocation2 + $0x54] sm:$0xf0]  ;;  %v916_v14 = vld [vmem:[#allocation2 + $0xd0] sm:$0xf] }
  0x17   :  { %308 = vmatpush.bf16.msra.mxu1 %v933_v7  ;;  %v925_v11 = vor.u32 %v1159_v9, %v924_v8  ;;  %v1157_v15 = vld [vmem:[#allocation2 + $0xd4] sm:$0xf0]  ;;  %v853_v16 = vor.u32 %v1141_v13, %v852_v12  ;;  %v844_v18 = vld [vmem:[#allocation2 + $0x40] sm:$0xf]  ;;  %v1139_v19 = vld [vmem:[#allocation2 + $0x44] sm:$0xf0] }
  0x18   :  { %v917_v17 = vor.u32 %v1157_v15, %v916_v14  ;;  %v908_v20 = vld [vmem:[#allocation2 + $0xc0] sm:$0xf]  ;;  %v1155_v21 = vld [vmem:[#allocation2 + $0xc4] sm:$0xf0]  ;;  %v845_v22 = vor.u32 %v1139_v19, %v844_v18  ;;  %v836_v24 = vld [vmem:[#allocation2 + $0x30] sm:$0xf] }
  0x19   :  { %v909_v23 = vor.u32 %v1155_v21, %v908_v20  ;;  %v1137_v25 = vld [vmem:[#allocation2 + $0x34] sm:$0xf0]  ;;  %v900_v26 = vld [vmem:[#allocation2 + $0xb0] sm:$0xf]  ;;  %v828_v30 = vld [vmem:[#allocation2 + $0x20] sm:$0xf] }
  0x1a   :  { %296 = vmatpush.bf16.msra.mxu0 %v861_v10  ;;  %v1153_v27 = vld [vmem:[#allocation2 + $0xb4] sm:$0xf0]  ;;  %v837_v28 = vor.u32 %v1137_v25, %v836_v24  ;;  %v1135_v31 = vld [vmem:[#allocation2 + $0x24] sm:$0xf0]  ;;  %v892_v32 = vld [vmem:[#allocation2 + $0xa0] sm:$0xf] }
  0x1b   :  { %309 = vmatpush.bf16.msra.mxu1 %v925_v11  ;;  %v901_v29 = vor.u32 %v1153_v27, %v900_v26  ;;  %v1151_v33 = vld [vmem:[#allocation2 + $0xa4] sm:$0xf0]  ;;  %v829_v34 = vor.u32 %v1135_v31, %v828_v30  ;;  %v820_v36 = vld [vmem:[#allocation2 + $0x10] sm:$0xf]  ;;  %v1133_v37 = vld [vmem:[#allocation2 + $0x14] sm:$0xf0] }
  0x1c   :  { %v893_v35 = vor.u32 %v1151_v33, %v892_v32  ;;  %v884_v38 = vld [vmem:[#allocation2 + $0x90] sm:$0xf]  ;;  %v1149_v39 = vld [vmem:[#allocation2 + $0x94] sm:$0xf0]  ;;  %v821_v40 = vor.u32 %v1133_v37, %v820_v36  ;;  %v95_v41 = vld [vmem:[%s1438_s0] sm:$0xff] }
  0x1d   :  { %v885_v42 = vor.u32 %v1149_v39, %v884_v38  ;;  %v812_v43 = vld [vmem:[#allocation2] sm:$0xf]  ;;  %v1131_v44 = vld [vmem:[#allocation2 + $0x4] sm:$0xf0]  ;;  %v129_v47 = vunpack.c.l.b16 %v95_v41  ;;  %v130_v49 = vunpack.c.h.b16 %v95_v41  ;;  %v1169_v51 = vld [vmem:[#allocation4 + $0x38] sm:$0xff] }
  0x1e   :  { %297 = vmatpush.bf16.msra.mxu0 %v853_v16  ;;  %v876_v45 = vld [vmem:[#allocation2 + $0x80] sm:$0xf]  ;;  %v1147_v46 = vld [vmem:[#allocation2 + $0x84] sm:$0xf0]  ;;  %v813_v48 = vor.u32 %v1131_v44, %v812_v43  ;;  %v1177_v52 = vld [vmem:[#allocation4 + $0x78] sm:$0xff] }
  0x1f   :  { %310 = vmatpush.bf16.msra.mxu1 %v917_v17  ;;  %v877_v50 = vor.u32 %v1147_v46, %v876_v45  ;;  %v1401_v53 = vpack.c.b16 %v129_v47, %v129_v47  ;;  %v1168_v54 = vld [vmem:[#allocation4 + $0x30] sm:$0xff]  ;;  %v1403_v56 = vpack.c.b16 %v130_v49, %v130_v49  ;;  %v870_v58 = vld [vmem:[#allocation2 + $0x78] sm:$0xf0]  ;;  %v1142_v62 = vld [vmem:[#allocation2 + $0x64] sm:$0xf] }
  0x20   :  { %v1176_v55 = vld [vmem:[#allocation4 + $0x70] sm:$0xff]  ;;  %v934_v61 = vld [vmem:[#allocation2 + $0xf8] sm:$0xf0]  ;;  %v862_v63 = vld [vmem:[#allocation2 + $0x68] sm:$0xf0] }
  0x21   :  { %v1144_v57 = vld [vmem:[#allocation2 + $0x74] sm:$0xf]  ;;  %v1158_v1 = vld [vmem:[#allocation2 + $0xe4] sm:$0xf]  ;;  %v926_v2 = vld [vmem:[#allocation2 + $0xe8] sm:$0xf0]  ;;  %v865_v3 = vor.u32 %v1142_v62, %v862_v63 }
  0x22   :  { %298 = vmatpush.bf16.msra.mxu0 %v845_v22  ;;  %v1160_v59 = vld [vmem:[#allocation2 + $0xf4] sm:$0xf]  ;;  %v873_v60 = vor.u32 %v1144_v57, %v870_v58  ;;  %v1167_v4 = vld [vmem:[#allocation4 + $0x28] sm:$0xff]  ;;  %v929_v5 = vor.u32 %v1158_v1, %v926_v2  ;;  %v854_v7 = vld [vmem:[#allocation2 + $0x58] sm:$0xf0] }
  0x23   :  { %311 = vmatpush.bf16.msra.mxu1 %v909_v23  ;;  %v937_v0 = vor.u32 %v1160_v59, %v934_v61  ;;  %v1140_v6 = vld [vmem:[#allocation2 + $0x54] sm:$0xf]  ;;  %v1175_v8 = vld [vmem:[#allocation4 + $0x68] sm:$0xff]  ;;  %v918_v10 = vld [vmem:[#allocation2 + $0xd8] sm:$0xf0] }
  0x24   :  { %321 = vmatpush.bf16.msra.mxu2 %v873_v60  ;;  %v1156_v9 = vld [vmem:[#allocation2 + $0xd4] sm:$0xf]  ;;  %v857_v11 = vor.u32 %v1140_v6, %v854_v7  ;;  %v1166_v12 = vld [vmem:[#allocation4 + $0x20] sm:$0xff]  ;;  %v846_v15 = vld [vmem:[#allocation2 + $0x48] sm:$0xf0] }
  0x25   :  { %334 = vmatpush.bf16.msra.mxu3 %v937_v0  ;;  %v921_v13 = vor.u32 %v1156_v9, %v918_v10  ;;  %v1138_v14 = vld [vmem:[#allocation2 + $0x44] sm:$0xf]  ;;  %v910_v18 = vld [vmem:[#allocation2 + $0xc8] sm:$0xf0]  ;;  %v1165_v20 = vld [vmem:[#allocation4 + $0x18] sm:$0xff] }
  0x26   :  { %299 = vmatpush.bf16.msra.mxu0 %v837_v28  ;;  %v1174_v16 = vld [vmem:[#allocation4 + $0x60] sm:$0xff]  ;;  %v849_v19 = vor.u32 %v1138_v14, %v846_v15  ;;  %v1136_v22 = vld [vmem:[#allocation2 + $0x34] sm:$0xf]  ;;  %v838_v23 = vld [vmem:[#allocation2 + $0x38] sm:$0xf0] }
  0x27   :  { %312 = vmatpush.bf16.msra.mxu1 %v901_v29  ;;  %v1154_v17 = vld [vmem:[#allocation2 + $0xc4] sm:$0xf]  ;;  %v1173_v24 = vld [vmem:[#allocation4 + $0x58] sm:$0xff]  ;;  %v1152_v25 = vld [vmem:[#allocation2 + $0xb4] sm:$0xf]  ;;  %v841_v27 = vor.u32 %v1136_v22, %v838_v23 }
  0x28   :  { %322 = vmatpush.bf16.msra.mxu2 %v865_v3  ;;  %v913_v21 = vor.u32 %v1154_v17, %v910_v18  ;;  %v902_v26 = vld [vmem:[#allocation2 + $0xb8] sm:$0xf0]  ;;  %v1164_v28 = vld [vmem:[#allocation4 + $0x10] sm:$0xff]  ;;  %v1134_v30 = vld [vmem:[#allocation2 + $0x24] sm:$0xf] }
  0x29   :  { %335 = vmatpush.bf16.msra.mxu3 %v929_v5  ;;  %v905_v29 = vor.u32 %v1152_v25, %v902_v26  ;;  %v830_v31 = vld [vmem:[#allocation2 + $0x28] sm:$0xf0]  ;;  %v1172_v32 = vld [vmem:[#allocation4 + $0x50] sm:$0xff]  ;;  %v1150_v33 = vld [vmem:[#allocation2 + $0xa4] sm:$0xf] }
  0x2a   :  { %300 = vmatpush.bf16.msra.mxu0 %v829_v34  ;;  %v894_v34 = vld [vmem:[#allocation2 + $0xa8] sm:$0xf0]  ;;  %v1132_v38 = vld [vmem:[#allocation2 + $0x14] sm:$0xf]  ;;  %v822_v39 = vld [vmem:[#allocation2 + $0x18] sm:$0xf0] }
  0x2b   :  { %313 = vmatpush.bf16.msra.mxu1 %v893_v35  ;;  %v833_v35 = vor.u32 %v1134_v30, %v830_v31  ;;  %v1163_v36 = vld [vmem:[#allocation4 + $0x8] sm:$0xff]  ;;  %v897_v37 = vor.u32 %v1150_v33, %v894_v34  ;;  %v1148_v41 = vld [vmem:[#allocation2 + $0x94] sm:$0xf]  ;;  %v825_v43 = vor.u32 %v1132_v38, %v822_v39  ;;  %v1162_v44 = vld [vmem:[#allocation4] sm:$0xff] }
  0x2c   :  { %323 = vmatpush.bf16.msra.mxu2 %v857_v11  ;;  %v1170_v46 = vld [vmem:[#allocation4 + $0x40] sm:$0xff]  ;;  %v1192_v57 = vld [vmem:[#allocation6 + $0x74] sm:$0xf]  ;;  %v1062_v59 = vld [vmem:[#allocation6 + $0x78] sm:$0xf0] }
  0x2d   :  { %336 = vmatpush.bf16.msra.mxu3 %v921_v13  ;;  %v1130_v47 = vld [vmem:[#allocation2 + $0x4] sm:$0xf]  ;;  %v1124_v60 = vld [vmem:[#allocation7 + $0x70] sm:$0xf]  ;;  %v1209_v61 = vld [vmem:[#allocation7 + $0x74] sm:$0xf0]  ;;  %v1065_v62 = vor.u32 %v1192_v57, %v1062_v59 }
  0x2e   :  { %301 = vmatpush.bf16.msra.mxu0 %v821_v40  ;;  %v1171_v40 = vld [vmem:[#allocation4 + $0x48] sm:$0xff]  ;;  %v1146_v49 = vld [vmem:[#allocation2 + $0x84] sm:$0xf]  ;;  %v1125_v63 = vor.u32 %v1209_v61, %v1124_v60  ;;  %v1208_v0 = vld [vmem:[#allocation7 + $0x74] sm:$0xf] }
  0x2f   :  { %314 = vmatpush.bf16.msra.mxu1 %v885_v42  ;;  %v886_v42 = vld [vmem:[#allocation2 + $0x98] sm:$0xf0]  ;;  %v1052_v2 = vld [vmem:[#allocation6 + $0x60] sm:$0xf]  ;;  %v1190_v5 = vld [vmem:[#allocation6 + $0x64] sm:$0xf] }
  0x30   :  { %324 = vmatpush.bf16.msra.mxu2 %v849_v19  ;;  %v889_v45 = vor.u32 %v1148_v41, %v886_v42  ;;  %v1126_v1 = vld [vmem:[#allocation7 + $0x78] sm:$0xf0]  ;;  %v1054_v6 = vld [vmem:[#allocation6 + $0x68] sm:$0xf0]  ;;  %v1116_v9 = vld [vmem:[#allocation7 + $0x60] sm:$0xf] }
  0x31   :  { %337 = vmatpush.bf16.msra.mxu3 %v913_v21  ;;  %v1129_v3 = vor.u32 %v1208_v0, %v1126_v1  ;;  %v1207_v10 = vld [vmem:[#allocation7 + $0x64] sm:$0xf0]  ;;  %v1206_v11 = vld [vmem:[#allocation7 + $0x64] sm:$0xf]  ;;  %v1118_v13 = vld [vmem:[#allocation7 + $0x68] sm:$0xf0] }
  0x32   :  { %302 = vmatpush.bf16.msra.mxu0 %v813_v48  ;;  %v814_v48 = vld [vmem:[#allocation2 + $0x8] sm:$0xf0]  ;;  %v1044_v14 = vld [vmem:[#allocation6 + $0x50] sm:$0xf]  ;;  %v1189_v15 = vld [vmem:[#allocation6 + $0x54] sm:$0xf0] }
  0x33   :  { %315 = vmatpush.bf16.msra.mxu1 %v877_v50  ;;  %v817_v50 = vor.u32 %v1130_v47, %v814_v48  ;;  %v1046_v17 = vld [vmem:[#allocation6 + $0x58] sm:$0xf0]  ;;  %v1108_v18 = vld [vmem:[#allocation7 + $0x50] sm:$0xf]  ;;  %v1045_v19 = vor.u32 %v1189_v15, %v1044_v14  ;;  %v1187_v25 = vld [vmem:[#allocation6 + $0x44] sm:$0xf0] }
  0x34   :  { %325 = vmatpush.bf16.msra.mxu2 %v841_v27  ;;  %v1110_v21 = vld [vmem:[#allocation7 + $0x58] sm:$0xf0]  ;;  %v1186_v26 = vld [vmem:[#allocation6 + $0x44] sm:$0xf]  ;;  %v1203_v30 = vld [vmem:[#allocation7 + $0x44] sm:$0xf0] }
  0x35   :  { %303 = vmatmul.bf16.vlgmr.msra.gmra.mxu0 %v1401_v53  ;;  %338 = vmatpush.bf16.msra.mxu3 %v905_v29  ;;  %v1100_v29 = vld [vmem:[#allocation7 + $0x40] sm:$0xf]  ;;  %v1202_v31 = vld [vmem:[#allocation7 + $0x44] sm:$0xf]  ;;  %v1184_v38 = vld [vmem:[#allocation6 + $0x34] sm:$0xf] }
  0x36   :  { %481 = vmatpush.bf16.msrb.mxu0 %v1169_v51  ;;  %316 = vmatmul.bf16.vlgmr.msra.gmra.mxu1 %v1403_v56  ;;  %v878_v51 = vld [vmem:[#allocation2 + $0x88] sm:$0xf0]  ;;  %v1092_v41 = vld [vmem:[#allocation7 + $0x30] sm:$0xf]  ;;  %v1201_v42 = vld [vmem:[#allocation7 + $0x34] sm:$0xf0] }
  0x37   :  { %494 = vmatpush.bf16.msrb.mxu1 %v1177_v52  ;;  %v881_v52 = vor.u32 %v1146_v49, %v878_v51  ;;  %v1093_v47 = vor.u32 %v1201_v42, %v1092_v41  ;;  %v1020_v48 = vld [vmem:[#allocation6 + $0x20] sm:$0xf]  ;;  %v1183_v49 = vld [vmem:[#allocation6 + $0x24] sm:$0xf0]  ;;  %v1198_v57 = vld [vmem:[#allocation7 + $0x24] sm:$0xf] }
  0x38   :  { %326 = vmatpush.bf16.msra.mxu2 %v833_v35  ;;  %v1101_v35 = vor.u32 %v1203_v30, %v1100_v29  ;;  %v1021_v59 = vor.u32 %v1183_v49, %v1020_v48  ;;  %v1181_v0 = vld [vmem:[#allocation6 + $0x14] sm:$0xf0]  ;;  %v1180_v1 = vld [vmem:[#allocation6 + $0x14] sm:$0xf]  ;;  %v1179_v14 = vld [vmem:[#allocation6 + $0x4] sm:$0xf0] }
  0x39   :  { %339 = vmatpush.bf16.msra.mxu3 %v897_v37  ;;  %v1185_v37 = vld [vmem:[#allocation6 + $0x34] sm:$0xf0]  ;;  %v1178_v15 = vld [vmem:[#allocation6 + $0x4] sm:$0xf] }
  0x3a   :  { %482 = vmatpush.bf16.msrb.mxu0 %v1168_v54  ;;  %v1060_v54 = vld [vmem:[#allocation6 + $0x70] sm:$0xf] }
  0x3b   :  { %495 = vmatpush.bf16.msrb.mxu1 %v1176_v55  ;;  %v1193_v55 = vld [vmem:[#allocation6 + $0x74] sm:$0xf0] }
  0x3c   :  { %327 = vmatpush.bf16.msra.mxu2 %v825_v43  ;;  %v1061_v58 = vor.u32 %v1193_v55, %v1060_v54  ;;  %v1200_v43 = vld [vmem:[#allocation7 + $0x34] sm:$0xf]  ;;  %v1084_v54 = vld [vmem:[#allocation7 + $0x20] sm:$0xf]  ;;  %v1199_v55 = vld [vmem:[#allocation7 + $0x24] sm:$0xf0] }
  0x3d   :  { %340 = vmatpush.bf16.msra.mxu3 %v889_v45  ;;  %v1085_v61 = vor.u32 %v1199_v55, %v1084_v54 }
  0x3e   :  { %483 = vmatpush.bf16.msrb.mxu0 %v1167_v4  ;;  %v1191_v4 = vld [vmem:[#allocation6 + $0x64] sm:$0xf0] }
  0x3f   :  { %496 = vmatpush.bf16.msrb.mxu1 %v1175_v8  ;;  %v1053_v7 = vor.u32 %v1191_v4, %v1052_v2  ;;  %v1057_v8 = vor.u32 %v1190_v5, %v1054_v6  ;;  %v1076_v4 = vld [vmem:[#allocation7 + $0x10] sm:$0xf]  ;;  %v1197_v5 = vld [vmem:[#allocation7 + $0x14] sm:$0xf0] }
  0x40   :  { %328 = vmatpush.bf16.msra.mxu2 %v817_v50  ;;  %v1182_v50 = vld [vmem:[#allocation6 + $0x24] sm:$0xf] }
  0x41   :  { %341 = vmatpush.bf16.msra.mxu3 %v881_v52  ;;  %v1022_v52 = vld [vmem:[#allocation6 + $0x28] sm:$0xf0] }
  0x42   :  { %484 = vmatpush.bf16.msrb.mxu0 %v1166_v12  ;;  %v1117_v12 = vor.u32 %v1207_v10, %v1116_v9  ;;  %v1025_v60 = vor.u32 %v1182_v50, %v1022_v52  ;;  %v1078_v9 = vld [vmem:[#allocation7 + $0x18] sm:$0xf0] }
  0x43   :  { %497 = vmatpush.bf16.msrb.mxu1 %v1174_v16  ;;  %329 = vmatmul.bf16.vlgmr.msra.gmra.mxu2 %v1401_v53  ;;  %v1188_v16 = vld [vmem:[#allocation6 + $0x54] sm:$0xf] }
  0x44   :  { %611 = vmatpush.bf16.msrb.mxu2 %v1061_v58  ;;  %342 = vmatmul.bf16.vlgmr.msra.gmra.mxu3 %v1403_v56  ;;  %v1049_v22 = vor.u32 %v1188_v16, %v1046_v17  ;;  %v1086_v58 = vld [vmem:[#allocation7 + $0x28] sm:$0xf0] }
  0x45   :  { %624 = vmatpush.bf16.msrb.mxu3 %v1065_v62  ;;  %v1089_v62 = vor.u32 %v1198_v57, %v1086_v58  ;;  %v1006_v17 = vld [vmem:[#allocation6 + $0x8] sm:$0xf0] }
  0x46   :  { %485 = vmatpush.bf16.msrb.mxu0 %v1165_v20  ;;  %v1205_v20 = vld [vmem:[#allocation7 + $0x54] sm:$0xf0] }
  0x47   :  { %498 = vmatpush.bf16.msrb.mxu1 %v1173_v24  ;;  %v1109_v23 = vor.u32 %v1205_v20, %v1108_v18  ;;  %v1036_v24 = vld [vmem:[#allocation6 + $0x40] sm:$0xf]  ;;  %v1009_v20 = vor.u32 %v1178_v15, %v1006_v17 }
  0x48   :  { %612 = vmatpush.bf16.msrb.mxu2 %v1053_v7  ;;  %v1037_v33 = vor.u32 %v1187_v25, %v1036_v24  ;;  %v1077_v7 = vor.u32 %v1197_v5, %v1076_v4  ;;  %v1068_v18 = vld [vmem:[#allocation7] sm:$0xf] }
  0x49   :  { %625 = vmatpush.bf16.msrb.mxu3 %v1057_v8  ;;  %v1196_v8 = vld [vmem:[#allocation7 + $0x14] sm:$0xf] }
  0x4a   :  { %486 = vmatpush.bf16.msrb.mxu0 %v1164_v28  ;;  %v1038_v28 = vld [vmem:[#allocation6 + $0x48] sm:$0xf0] }
  0x4b   :  { %499 = vmatpush.bf16.msrb.mxu1 %v1172_v32  ;;  %v1102_v32 = vld [vmem:[#allocation7 + $0x48] sm:$0xf0]  ;;  %v1041_v34 = vor.u32 %v1186_v26, %v1038_v28  ;;  %v1218_v26 = vld [vmem:[%s1441_s3] ss:$0 sm:$0xff] }
  0x4c   :  { %613 = vmatpush.bf16.msrb.mxu2 %v1045_v19  ;;  %v1105_v39 = vor.u32 %v1202_v31, %v1102_v32  ;;  %v1195_v19 = vld [vmem:[#allocation7 + $0x4] sm:$0xf0] }
  0x4d   :  { %626 = vmatpush.bf16.msrb.mxu3 %v1049_v22  ;;  %v1070_v22 = vld [vmem:[#allocation7 + $0x8] sm:$0xf0] }
  0x4e   :  { %487 = vmatpush.bf16.msrb.mxu0 %v1163_v36  ;;  %v1028_v36 = vld [vmem:[#allocation6 + $0x30] sm:$0xf] }
  0x4f   :  { %500 = vmatpush.bf16.msrb.mxu1 %v1171_v40  ;;  %v1030_v40 = vld [vmem:[#allocation6 + $0x38] sm:$0xf0]  ;;  %v1029_v45 = vor.u32 %v1185_v37, %v1028_v36 }
  0x50   :  { %614 = vmatpush.bf16.msrb.mxu2 %v1037_v33 }
  0x51   :  { %627 = vmatpush.bf16.msrb.mxu3 %v1041_v34 }
  0x52   :  { %488 = vmatpush.bf16.msrb.mxu0 %v1162_v44  ;;  %v1094_v44 = vld [vmem:[#allocation7 + $0x38] sm:$0xf0] }
  0x53   :  { %501 = vmatpush.bf16.msrb.mxu1 %v1170_v46  ;;  %v1033_v46 = vor.u32 %v1184_v38, %v1030_v40  ;;  %v1097_v51 = vor.u32 %v1200_v43, %v1094_v44  ;;  %v655_v40 = vld [vmem:[%s1445_s7] sm:$0x3] }
  0x54   :  { %615 = vmatpush.bf16.msrb.mxu2 %v1029_v45  ;;  %v657_v41 = vperm.slane %v655_v40, 0  ;;  %v658_v42 = vperm.slane %v655_v40, 1  ;;  %v525_v43 = vld [vmem:[%s1443_s5] sm:$0x3] }
  0x55   :  { %489 = vmatmul.bf16.vlgmr.msrb.gmra.mxu0 %v1401_v53  ;;  %v1121_v53 = vor.u32 %v1206_v11, %v1118_v13  ;;  %628 = vmatpush.bf16.msrb.mxu3 %v1033_v46  ;;  %v1081_v11 = vor.u32 %v1196_v8, %v1078_v9  ;;  %v1004_v13 = vld [vmem:[#allocation6] sm:$0xf]  ;;  %v527_v48 = vperm.slane %v525_v43, 0  ;;  %v528_v49 = vperm.slane %v525_v43, 1 }
  0x56   :  { %502 = vmatmul.bf16.vlgmr.msrb.gmra.mxu1 %v1403_v56  ;;  %741 = vmatpush.bf16.msra.mxu0 %v1125_v63  ;;  %v1204_v56 = vld [vmem:[#allocation7 + $0x54] sm:$0xf]  ;;  %v1012_v63 = vld [vmem:[#allocation6 + $0x10] sm:$0xf]  ;;  %v1005_v16 = vor.u32 %v1179_v14, %v1004_v13 }
  0x57   :  { %754 = vmatpush.bf16.msra.mxu1 %v1129_v3  ;;  %v1113_v27 = vor.u32 %v1204_v56, %v1110_v21  ;;  %v1013_v2 = vor.u32 %v1181_v0, %v1012_v63  ;;  %v1014_v3 = vld [vmem:[#allocation6 + $0x18] sm:$0xf0]  ;;  %v1069_v56 = vor.u32 %v1195_v19, %v1068_v18  ;;  %v1194_v21 = vld [vmem:[#allocation7 + $0x4] sm:$0xf] }
  0x58   :  { %616 = vmatpush.bf16.msrb.mxu2 %v1021_v59  ;;  %v1017_v6 = vor.u32 %v1180_v1, %v1014_v3 }
  0x59   :  { %629 = vmatpush.bf16.msrb.mxu3 %v1025_v60 }
  0x5a   :  { %742 = vmatpush.bf16.msra.mxu0 %v1117_v12 }
  0x5b   :  { %755 = vmatpush.bf16.msra.mxu1 %v1121_v53 }
  0x5c   :  { %617 = vmatpush.bf16.msrb.mxu2 %v1013_v2 }
  0x5d   :  { %630 = vmatpush.bf16.msrb.mxu3 %v1017_v6 }
  0x5e   :  { %743 = vmatpush.bf16.msra.mxu0 %v1109_v23  ;;  %v1073_v23 = vor.u32 %v1194_v21, %v1070_v22 }
  0x5f   :  { %756 = vmatpush.bf16.msra.mxu1 %v1113_v27 }
  0x60   :  { %618 = vmatpush.bf16.msrb.mxu2 %v1005_v16 }
  0x61   :  { %631 = vmatpush.bf16.msrb.mxu3 %v1009_v20 }
  0x62   :  { %744 = vmatpush.bf16.msra.mxu0 %v1101_v35 }
  0x63   :  { %757 = vmatpush.bf16.msra.mxu1 %v1105_v39 }
  0x66   :  { %745 = vmatpush.bf16.msra.mxu0 %v1093_v47 }
  0x67   :  { %758 = vmatpush.bf16.msra.mxu1 %v1097_v51 }
  0x6a   :  { %746 = vmatpush.bf16.msra.mxu0 %v1085_v61 }
  0x6b   :  { %759 = vmatpush.bf16.msra.mxu1 %v1089_v62 }
  0x6e   :  { %747 = vmatpush.bf16.msra.mxu0 %v1077_v7 }
  0x6f   :  { %760 = vmatpush.bf16.msra.mxu1 %v1081_v11 }
  0x72   :  { %748 = vmatpush.bf16.msra.mxu0 %v1069_v56 }
  0x73   :  { %761 = vmatpush.bf16.msra.mxu1 %v1073_v23 }
  0xb2   :  { %v304_v10 = vpop.f32.mrf.mxu0 }
  0xb3   :  { %v317_v12 = vpop.f32.mrf.mxu1 }
  0xb4   :  { %v318_v53 = vadd.f32 %v317_v12, %v304_v10 }
  0xb6   :  { %347 = vst [vmem:[%s1446_s8] sm:$0xff] %v318_v53 }
  0xba   :  { %v306_v24 = vpop.f32.mrf.mxu0 }
  0xbb   :  { %v319_v25 = vpop.f32.mrf.mxu1 }
  0xc6   :  { %v330_v35 = vpop.f32.mrf.mxu2 }
  0xc7   :  { %v343_v36 = vpop.f32.mrf.mxu3 }
  0xc8   :  { %v344_v37 = vadd.f32 %v343_v36, %v330_v35 }
  0xca   :  { %348 = vst [vmem:[%s1446_s8 + $0x8] sm:$0xff] %v344_v37 }
  0xce   :  { %v332_v38 = vpop.f32.mrf.mxu2 }
  0xcf   :  { %v345_v39 = vpop.f32.mrf.mxu3 }
  0xd2   :  { %v490_v27 = vpop.f32.mrf.mxu0 }
  0xd3   :  { %v491_v28 = vadd.f32 %v1218_v26, %v490_v27  ;;  %v503_v29 = vpop.f32.mrf.mxu1 }
  0xd5   :  { %v504_v30 = vadd.f32 %v503_v29, %v491_v28 }
  0xd7   :  { %v507_v31 = vmax.f32 %v504_v30, 0.0 }
  0xd9   :  { %v508_v32 = vpack.c.bf16 %v507_v31, %v507_v31 }
  0xda   :  { %v492_v33 = vpop.f32.mrf.mxu0 }
  0xdb   :  { %v505_v34 = vpop.f32.mrf.mxu1  ;;  %619 = vmatmul.bf16.vlgmr.msrb.gmra.mxu2 %v508_v32  ;;  %632 = vmatmul.bf16.vlgmr.msrb.gmra.mxu3 %v508_v32 }
  0xdc   :  { %749 = vmatmul.bf16.vlgmr.msra.gmra.mxu0 %v508_v32  ;;  %762 = vmatmul.bf16.vlgmr.msra.gmra.mxu1 %v508_v32 }
 0x159   :  { %v750_v44 = vpop.f32.mrf.mxu0  ;;  %v763_v45 = vpop.f32.mrf.mxu1 }
 0x15a   :  { %v751_v46 = vadd.f32 %v750_v44, %v657_v41  ;;  %v764_v47 = vadd.f32 %v763_v45, %v658_v42 }
 0x15c   :  { %v767_v50 = vmin.f32 %v751_v46, %v764_v47  ;;  %v770_v59 = vmax.f32 %v751_v46, %v764_v47 }
 0x15e   :  { %768 = vmin.xlane.f32.xlu0 %v767_v50  ;;  %v620_v51 = vpop.f32.mrf.mxu2  ;;  %v633_v52 = vpop.f32.mrf.mxu3 }
 0x15f   :  { %v621_v54 = vadd.f32 %v620_v51, %v527_v48  ;;  %v634_v55 = vadd.f32 %v633_v52, %v528_v49 }
 0x161   :  { %637 = vst [vmem:[%s1447_s9] sm:$0xff] %v621_v54  ;;  %v752_v57 = vpop.f32.mrf.mxu0  ;;  %v765_v58 = vpop.f32.mrf.mxu1 }
 0x162   :  { %638 = vst [vmem:[%s1447_s9 + $0x8] sm:$0xff] %v634_v55 }
 0x166   :  { %771 = vmax.xlane.f32.xlu0 %v770_v59  ;;  %v622_v60 = vpop.f32.mrf.mxu2  ;;  %v635_v61 = vpop.f32.mrf.mxu3 }
 0x1d1   :  { %v769_v62 = vpop.xlane.xlu0 %768 }
 0x1d2   :  { %v773_v10 = vsub.f32 %v751_v46, %v769_v62  ;;  %v774_v11 = vsub.f32 %v764_v47, %v769_v62 }
 0x1d9   :  { %v772_v63 = vpop.xlane.xlu0 %771 }
 0x1da   :  { %v775_v0 = vsub.f32 %v772_v63, %v769_v62 }
 0x1dc   :  { %v776_v1 = vadd.f32 1e-08, %v775_v0 }
 0x1de   :  { %1219 = vrcp.f32 %v776_v1  ;;  %v788_v5 = vand.u32 2147483648, %v776_v1  ;;  %v786_v7 = vand.u32 2147483647, %v776_v1  ;;  %vm782_vm1 = vweird.f32 %v776_v1 }
 0x1e0   :  { %v789_v9 = vor.u32 1.1754944e-38, %v788_v5  ;;  %vm787_vm3 = vcmp.eq.f32.partialorder %v786_v7, 8.507059e+37 }
 0x1e4   :  { %v1220_v2 = vpop.eup %1219 }
 0x1e5   :  { %v778_v3 = vmul.f32 %v1220_v2, %v776_v1  ;;  %vm783_vm0 = vweird.f32 %v1220_v2 }
 0x1e6   :  { %vm784_vm2 = vmor %vm782_vm1, %vm783_vm0 }
 0x1e7   :  { %v779_v4 = vsub.f32 1.0, %v778_v3 }
 0x1e9   :  { %v780_v6 = vmul.f32 %v1220_v2, %v779_v4 }
 0x1eb   :  { %v781_v8 = vadd.f32 %v1220_v2, %v780_v6 }
 0x1ed   :  { %v785_v12 = vsel %vm784_vm2, %v1220_v2, %v781_v8 }
 0x1ee   :  { %v790_v13 = vsel %vm787_vm3, %v789_v9, %v785_v12 }
 0x1ef   :  { %v791_v14 = vmul.f32 %v790_v13, %v773_v10  ;;  %v792_v15 = vmul.f32 %v790_v13, %v774_v11 }
 0x1f1   :  { %793 = vst [vmem:[%s1448_s10] sm:$0xff] %v791_v14 }
 0x1f2   :  { %794 = vst [vmem:[%s1448_s10 + $0x8] sm:$0xff] %v792_v15 }
 0x1f3   :  { %807 = vsyncpa [#allocation3], 1 }
 0x1f4   :  { %808 = vsyncpa [#allocation5], 1 }
 0x1f5   :  { %809 = vsyncpa [#allocation8], 1 }

</bundles_post_ra>
